<compile_context>
chip_gen: v7x
topology: tpu7x:2x2x1
jax: 0.10.0
libtpu: 0.0.40
codegen_flags: <defaults>
</compile_context>

<pallas_src>
import jax
import jax.numpy as jnp
from jax.experimental import pallas as pl
from jax.experimental.pallas import tpu as pltpu


def _pos_embed_kernel(x_ref, pos_ref, o_ref):
    # x_ref / o_ref: (tB, tS, E) activation block.  pos_ref: (tS, E) table block
    # (resident across the inner batch-tile loop).  One implicit (tS,E)->(tB,tS,E)
    # broadcast per body invocation.
    o_ref[...] = x_ref[...] + pos_ref[...]
    # TODO(synk): dropout_prob > 0 would need pltpu.prng_seed (mixed with
    # pl.program_id) + pltpu.prng_random_bits masking; module default
    # dropout_prob=0 => identity.


def _round_up(x, m):
    return ((x + m - 1) // m) * m


def _cdiv(a, b):
    return -(-a // b)


# Per-block byte budget.  Measured tiled f32 add: ~85% of HBM roofline at ~2 MiB
# blocks, marginally better at ~4 MiB.  With double buffering the pipelined
# footprint is <= 2*(x_block + out_block + pos_block) <= ~24 MiB, covered by the
# explicit 32 MiB scoped-VMEM limit (<= physical on v5e/v6e 128 MiB and v7x 64 MiB).
_BLOCK_BUDGET_BYTES = 4 * 1024 * 1024
_VMEM_LIMIT_BYTES = 32 * 1024 * 1024


def _choose_tiles(B, S, E_pad, itemsize, budget_bytes):
    """Pick (tB, tS) so one (tB, tS, E_pad) block is ~budget_bytes.

    tS is a multiple of the native sublane packing (8 rows f32, 16 bf16, 32 int8).
    No divisibility of S or B is required: the grid uses cdiv and Pallas masks the
    ragged edge blocks.
    """
    sub = max(8, 32 // itemsize)              # native (sublane, 128) packing rows
    row_bytes = E_pad * itemsize

    # Seq rows per block (at least one packed sublane group, at most the budget).
    max_rows = max(sub, (budget_bytes // max(1, row_bytes)) // sub * sub)
    tS = min(_round_up(S, sub), max_rows)

    # Fold batch rows into the block until the budget is reached (amortizes the
    # ~0.35 us per-grid-step overhead instead of running num_seq_tiles*B tiny steps).
    tB = max(1, min(B, budget_bytes // max(1, tS * row_bytes)))

    # Megacore (v7x has 2 TensorCores): keep at least one parallel grid axis with
    # >= 2 steps; prefer splitting the batch-tile axis.
    if _cdiv(S, tS) * _cdiv(B, tB) == 1:
        if B >= 2:
            tB = _cdiv(B, 2)
        elif S >= 2 * sub:
            tS = _round_up(_cdiv(S, 2), sub)
    return tB, tS


def position_embedding_forward(input_tensor, pos_table):
    """input_tensor: (B, S, E); pos_table: (max_pos, E). Returns (B, S, E)."""
    B, S, E = input_tensor.shape
    max_pos, E_tbl = pos_table.shape
    if E_tbl != E:
        raise ValueError(f"embedding_size mismatch: input {E} vs table {E_tbl}")
    if S > max_pos:
        # Mirrors the nn.Embedding lookup contract; prevents OOB DMA of table rows.
        raise ValueError(f"seq_len ({S}) exceeds max_position_embeddings ({max_pos})")

    # Pin the table dtype to the activation dtype (avoids silent in-kernel promotion
    # and extra HBM traffic).
    if pos_table.dtype != input_tensor.dtype:
        pos_table = pos_table.astype(input_tensor.dtype)

    itemsize = jnp.dtype(input_tensor.dtype).itemsize

    # Lane-dense last dim: pad E to a multiple of 128 so stores are unmasked vst
    # (masked vst.msk partial stores are the biggest single wall-vs-compute lever).
    E_pad = _round_up(E, 128)
    x_in, tbl_in = input_tensor, pos_table
    if E_pad != E:
        # TODO(synk): if this add were fused into the producer/consumer kernel, this
        # pad pass (and the standalone read+write of the activation) would disappear.
        x_in = jnp.pad(input_tensor, ((0, 0), (0, 0), (0, E_pad - E)))
        tbl_in = jnp.pad(pos_table, ((0, 0), (0, E_pad - E)))

    tB, tS = _choose_tiles(B, S, E_pad, itemsize, _BLOCK_BUDGET_BYTES)

    # Grid order (seq_tile, batch_tile): the pos block index depends only on the
    # seq-tile index, so it stays VMEM-resident across the inner batch-tile loop.
    grid = (_cdiv(S, tS), _cdiv(B, tB))

    cost = pl.CostEstimate(
        flops=B * S * E_pad,                                     # one add per element
        transcendentals=0,
        bytes_accessed=(2 * B * S * E_pad + S * E_pad) * itemsize,
    )

    out = pl.pallas_call(
        _pos_embed_kernel,
        out_shape=jax.ShapeDtypeStruct((B, S, E_pad), input_tensor.dtype),
        grid_spec=pltpu.PrefetchScalarGridSpec(
            num_scalar_prefetch=0,
            grid=grid,
            in_specs=[
                pl.BlockSpec((tB, tS, E_pad), lambda s, b: (b, s, 0)),  # activations
                pl.BlockSpec((tS, E_pad), lambda s, b: (s, 0)),          # pos table rows
            ],
            out_specs=pl.BlockSpec((tB, tS, E_pad), lambda s, b: (b, s, 0)),
        ),
        compiler_params=pltpu.CompilerParams(
            dimension_semantics=("parallel", "parallel"),
            vmem_limit_bytes=_VMEM_LIMIT_BYTES,
        ),
        cost_estimate=cost,
    )(x_in, tbl_in)

    if E_pad != E:
        out = out[..., :E]
    return out


if __name__ == "__main__":
    key = jax.random.PRNGKey(0)
    k_x, k_emb, k_x2, k_emb2 = jax.random.split(key, 4)

    # Case 1: small, aligned shapes consistent with the module's forward.
    batch, seq_len, embedding_size, max_pos = 2, 8, 128, 256
    x = jax.random.normal(k_x, (batch, seq_len, embedding_size), dtype=jnp.float32)
    # Deterministic parameter init (nn.Embedding weight ~ N(0,1) by default).
    tbl = jax.random.normal(k_emb, (max_pos, embedding_size), dtype=jnp.float32)

    out = position_embedding_forward(x, tbl)
    jax.block_until_ready(out)
    ref = x + tbl[:seq_len][None, :, :]
    assert out.shape == (batch, seq_len, embedding_size)
    assert jnp.allclose(out, ref, atol=1e-6), "mismatch vs reference (aligned case)"

    # Case 2: ragged seq_len and non-lane-aligned embedding (exercises the cdiv grid,
    # edge-block masking, and the E-padding path).
    b2, s2, e2, mp2 = 2, 7, 96, 64
    x2 = jax.random.normal(k_x2, (b2, s2, e2), dtype=jnp.float32)
    tbl2 = jax.random.normal(k_emb2, (mp2, e2), dtype=jnp.float32)

    out2 = position_embedding_forward(x2, tbl2)
    jax.block_until_ready(out2)
    ref2 = x2 + tbl2[:s2][None, :, :]
    assert out2.shape == (b2, s2, e2)
    assert jnp.allclose(out2, ref2, atol=1e-6), "mismatch vs reference (ragged case)"

    print("KERNEL_OK")
</pallas_src>

<mosaic_0001>
module attributes {stable_mosaic.version = 11 : i64} {
  func.func @_pos_embed_kernel(%arg0: i32, %arg1: i32, %arg2: memref<1x8x128xf32, #tpu.memory_space<vmem>>, %arg3: memref<8x128xf32, #tpu.memory_space<vmem>>, %arg4: memref<1x8x128xf32, #tpu.memory_space<vmem>>) attributes {dimension_semantics = [#tpu.dimension_semantics<parallel>, #tpu.dimension_semantics<parallel>], iteration_bounds = array<i64: 1, 2>, scalar_prefetch = 0 : i64, scratch_operands = 0 : i64, tpu.core_type = #tpu.core_type<tc>, window_params = [{transform_indices = @transform_0, window_bounds = array<i64: 1, 8, 128>}, {transform_indices = @transform_1, window_bounds = array<i64: 8, 128>}, {transform_indices = @transform_2, window_bounds = array<i64: 1, 8, 128>}]} {
    %c0 = arith.constant 0 : index
    %c0_0 = arith.constant 0 : index
    %c0_1 = arith.constant 0 : index
    %0 = vector.load %arg2[%c0, %c0_0, %c0_1] : memref<1x8x128xf32, #tpu.memory_space<vmem>>, vector<1x8x128xf32>
    %c0_2 = arith.constant 0 : index
    %c0_3 = arith.constant 0 : index
    %1 = vector.load %arg3[%c0_2, %c0_3] : memref<8x128xf32, #tpu.memory_space<vmem>>, vector<8x128xf32>
    %2 = vector.shape_cast %1 : vector<8x128xf32> to vector<1x8x128xf32>
    %3 = arith.addf %0, %2 : vector<1x8x128xf32>
    %c0_4 = arith.constant 0 : index
    %c0_5 = arith.constant 0 : index
    %c0_6 = arith.constant 0 : index
    %4 = vector.load %arg4[%c0_4, %c0_5, %c0_6] : memref<1x8x128xf32, #tpu.memory_space<vmem>>, vector<1x8x128xf32>
    tpu.vector_store %arg4[%c0_4, %c0_5, %c0_6], %3 {strides = array<i32>} : memref<1x8x128xf32, #tpu.memory_space<vmem>>, vector<1x8x128xf32>,
    return
  }
  func.func @transform_0(%arg0: i32, %arg1: i32) -> (i32, i32, i32) {
    %c0_i32 = arith.constant 0 : i32
    %c0_i32_0 = arith.constant 0 : i32
    return %arg1, %arg0, %c0_i32 : i32, i32, i32
  }
  func.func @transform_1(%arg0: i32, %arg1: i32) -> (i32, i32) {
    %c0_i32 = arith.constant 0 : i32
    %c0_i32_0 = arith.constant 0 : i32
    return %arg0, %c0_i32 : i32, i32
  }
  func.func @transform_2(%arg0: i32, %arg1: i32) -> (i32, i32, i32) {
    %c0_i32 = arith.constant 0 : i32
    %c0_i32_0 = arith.constant 0 : i32
    return %arg1, %arg0, %c0_i32 : i32, i32, i32
  }
}

</mosaic_0001>

<bundles_post_ra>
// kernel: tpu_custom_call.1
= control target key start
LH: loop header
LB: loop body
LE: loop exit
PB: predicated region body
PF: predicated region fallthrough
CT: control target
= control target key end

     0   :  { %7 = vsyncpa [#allocation3], 0  ;;  %s778_s0 = inlined_call_operand.hbm [shape: f32[2,8,128], index: 0, kind: input, shape index: {}]   ;;  %s779_s1 = inlined_call_operand.hbm [shape: f32[256,128], index: 1, kind: input, shape index: {}]   ;;  %s780_s2 = inlined_call_operand.hbm [shape: f32[2,8,128], index: 2, kind: output, shape index: {}]  }
   0x1   :  { %9 = vsyncpa [#allocation3 + $0x1], 0 }
   0x2   :  { %10 = vsyncpa [#allocation6], 0 }
   0x3   :  { %11 = vsyncpa [#allocation4], 0 }
   0x4   :  { %13 = vsyncpa [#allocation4 + $0x1], 0  ;;  %s559_s9 = smov 0   ;;  %s561_s10 = smov 0  }
   0x5   :  { %s563_s11 = smov 0   ;;  %s565_s12 = smov 0  }
   0x6   :  { %s567_s13 = smov 0   ;;  %s569_s14 = smov 0  }
   0x7 LB: > { %s307_s15 = sadd.s32 4294967295, %s539_s14   ;;  %s308_s16 = sadd.s32 4294967294, %s539_s14   ;;  %s539_s14 = sphi %s569_s14, %s19_s14   ;;  %s535_s13 = sphi %s567_s13, %s805_s13   ;;  %s531_s12 = sphi %s565_s12, %s804_s12   ;;  %s527_s11 = sphi %s563_s11, %s803_s11   ;;  %s523_s10 = sphi %s561_s10, %s802_s10   ;;  %s519_s9 = sphi %s559_s9, %s801_s9  }
   0x8   : > { %p53_p0 = scmp.ne.s32.totalorder %s523_s10, %s519_s9  ;;  %p593_p1 = scmp.eq.s32.totalorder %s307_s15, 0 }
   0x9   : > { %p597_p2 = scmp.eq.s32.totalorder %s307_s15, 1  ;;  %p111_p3 = scmp.eq.s32.totalorder %s308_s16, 1 }
   0xa   : > { %s785_s17 = scalar_select %p593_p1, 1, 0 }
   0xb   : > { %s786_s18 = scalar_select %p597_p2, 1, 0 }
   0xc   : > { %p603_p4 = por %p593_p1, %p53_p0  ;;  %p309_p5 = scmp.ge.s32.totalorder %s539_s14, 1 }
   0xd   : > { %p608_p6 = por %p111_p3, %p53_p0  ;;  %p118_p7 = scmp.lt.s32.totalorder %s539_s14, 3 }
   0xe   : > { %s787_s19 = scalar_select %p603_p4, 1, 0 }
   0xf   : > { %s788_s20 = scalar_select %p608_p6, 1, 0 }
  0x10   : > { %p613_p8 = pnand %p309_p5, %p118_p7  ;;  %s541_s22 = smov [#allocation5]  }
  0x11   : > { %s133_s23 = sshll.u32 %s541_s22, 4  ;;  %s28_s25 = sadd.s32 1, %s535_s13  ;;  %s134_s23 = int_to_ptr.vmem [resolvable:$true] %s133_s23 }
  0x12   : > { %s789_s21 = scalar_select %p613_p8, 1, 0 }
  0x13   : > { %p330_p10 = pneg %p613_p8  ;;  %s40_s26 = sadd.s32 1, %s527_s11 }
  0x14   : > { %p628_p12 = scmp.ge.s32.totalorder %s28_s25, 2  ;;  %s395_s30 = scalar_lea.hbm %s779_s1, 128 }
  0x15   : > { %p622_p11 = pnand %p330_p10, %p593_p1  ;;  %p396_p13 = scmp.ne.s32.totalorder %s779_s1, %s395_s30 }
  0x16   : > { %s791_s27 = scalar_select %p628_p12, 1, 0 }
  0x17   : > { %p397_p0 = pneg %p622_p11  ;;  %s400_s7 = scalar_lea.hbm %s779_s1, 4096 }
  0x18   : > { %p401_p7 = scmp.lt.u32.totalorder %s400_s7, %s395_s30  ;;  %p402_p10 = scmp.lt.u32.totalorder %s395_s30, %s779_s1 }
  0x19   : > { %p398_p3 = pnand %p397_p0, %p396_p13 }
  0x1a   : > { %p403_p9 = por %p402_p10, %p401_p7 }
  0x1b   : > { %p399_p5 = pneg %p398_p3 }
  0x1d   : > { %p404_p6 = pnand %p403_p9, %p399_p5 }
  0x1f   : > { %407 = shalt.err (!%p404_p6)
}
  0x20   : > { %s408_s16 = scalar_lea.vmem %s134_s23, 128  ;;  %p416_p2 = scmp.lt.s32.totalorder %s134_s23, %s134_s23 }
  0x21   : > { %p409_p1 = scmp.ne.s32.totalorder %s134_s23, %s408_s16  ;;  %p417_p12 = scmp.lt.s32.totalorder %s408_s16, %s408_s16 }
  0x23   : > { %p411_p4 = pnand %p409_p1, %p397_p0  ;;  %p418_p13 = por %p417_p12, %p416_p2 }
  0x25   : > { %p412_p8 = pneg %p411_p4 }
  0x27   : > { %p419_p3 = pnand %p418_p13, %p412_p8 }
  0x29   : > { %422 = shalt.err (!%p419_p3)
}
  0x2a   : > { %333 = dma.hbm_to_vmem [thread:$0]  (!%p622_p11), %s779_s1, 128, %s134_s23, [#allocation6]  }
  0x2b   : > { %p792_p1 = scmp.ne.s32.totalorder %s791_s27, 0  ;;  %p47_p2 = scmp.ne.s32.totalorder %s527_s11, %s523_s10 }
  0x2c   : > { %p48_p4 = scmp.eq.s32.totalorder %s539_s14, 0  ;;  %p343_p6 = scmp.lt.s32.totalorder %s539_s14, 2 }
  0x2d   : > { %s807_s25 = smov (%p792_p1, %s28_s25), 0  ;;  %p793_p12 = scmp.ne.s32.totalorder %s786_s18, 0 }
  0x2e   : > { %s35_s24 = ssub.s32 %s535_s13, %s807_s25  ;;  %p49_p9 = por %p48_p4, %p47_p2 }
  0x2f   : > { %p38_p8 = scmp.eq.s32.totalorder %s35_s24, 0  ;;  %p663_p0 = por %p793_p12, %p47_p2 }
  0x30   : > { %s144_s30 = sand.u32 1, %s527_s11   ;;  %s313_s27 = sshll.u32 %s535_s13, 7 }
  0x31   : > { %s671_s3 = scalar_select %p38_p8, %s527_s11, %s40_s26  }
  0x32   : > { %s312_s23 = sshll.u32 %s144_s30, 3  ;;  %s677_s6 = scalar_lea.hbm %s778_s0, %s313_s27 }
  0x33   : > { %s148_s18 = scalar_lea.vmem [#allocation2], %s312_s23  ;;  %p681_p11 = pnand %p343_p6, %p49_p9 }
  0x34   : > { %s156_s7 = sshll.u32 %s148_s18, 4  ;;  %s145_s26 = scalar_lea.sflag [#allocation3], %s144_s30  ;;  %s679_s7 = int_to_ptr.vmem [resolvable:$true] %s156_s7 }
  0x35   : > { %s423_s15 = scalar_lea.hbm %s677_s6, 128  ;;  %p425_p7 = pneg %p681_p11 }
  0x36   : > { %p424_p5 = scmp.ne.s32.totalorder %s677_s6, %s423_s15  ;;  %s428_s28 = scalar_lea.hbm %s778_s0, 256 }
  0x37   : > { %p429_p3 = scmp.lt.u32.totalorder %s677_s6, %s778_s0  ;;  %p430_p1 = scmp.lt.u32.totalorder %s428_s28, %s423_s15 }
  0x38   : > { %p426_p10 = pnand %p425_p7, %p424_p5  ;;  %p432_p4 = scmp.lt.u32.totalorder %s423_s15, %s677_s6 }
  0x39   : > { %p431_p2 = por %p430_p1, %p429_p3 }
  0x3a   : > { %p427_p13 = pneg %p426_p10 }
  0x3b   : > { %p433_p6 = por %p432_p4, %p431_p2 }
  0x3d   : > { %p434_p8 = pnand %p433_p6, %p427_p13 }
  0x3f   : > { %437 = shalt.err (!%p434_p8)
}
  0x40   : > { %s438_s30 = scalar_lea.vmem %s679_s7, 128  ;;  %s542_s27 = smov [#allocation2]  }
  0x41   : > { %p439_p9 = scmp.ne.s32.totalorder %s679_s7, %s438_s30  ;;  %s443_s4 = sshll.u32 %s542_s27, 4  ;;  %s444_s4 = int_to_ptr.vmem [resolvable:$false] %s443_s4 }
  0x42   : > { %s445_s5 = scalar_lea.vmem %s444_s4, 256  ;;  %p446_p10 = scmp.lt.s32.totalorder %s679_s7, %s444_s4 }
  0x43   : > { %p441_p12 = pnand %p439_p9, %p425_p7  ;;  %p447_p3 = scmp.lt.s32.totalorder %s445_s5, %s438_s30 }
  0x45   : > { %p442_p5 = pneg %p441_p12  ;;  %p448_p1 = por %p447_p3, %p446_p10 }
  0x47   : > { %p449_p2 = pnand %p448_p1, %p442_p5 }
  0x49   : > { %452 = shalt.err (!%p449_p2)
}
  0x4a   : > { %337 = dma.hbm_to_vmem [thread:$0]  (!%p681_p11), %s677_s6, 128, %s679_s7, %s145_s26  }
  0x4b   : > { %p796_p13 = scmp.ne.s32.totalorder %s789_s21, 0 }
  0x4c   : > { %s713_s18 = sand.u32 (!%p796_p13), 1, %s523_s10   ;;  %p797_p7 = scmp.ne.s32.totalorder (!%p796_p13), %s787_s19, 0 }
  0x4d   : > { %165 = sbr.rel (%p796_p13) target bundleno = 113 (0x71), region = 28  ;;  %s315_s15 = sshll.u32 (!%p796_p13), %s713_s18, 3 }
  0x4e   : > { %s168_s16 = scalar_lea.sflag (!%p796_p13), [#allocation3], %s713_s18  ;;  %s171_s22 = scalar_lea.vmem (!%p796_p13), [#allocation2], %s315_s15 }
  0x54   : > { %506 = dma.done.wait (%p797_p7), %s168_s16, 128  }
  0x55   : > { %508 = vsyncadd (%p797_p7), %s168_s16, 4294967168  ;;  %p798_p4 = scmp.ne.s32.totalorder %s785_s17, 0 }
  0x57   : > { %510 = dma.done.wait (%p798_p4), [#allocation6], 128  }
  0x58   : > { %512 = vsyncadd (%p798_p4), [#allocation6], 4294967168  ;;  %s195_s21 = scalar_lea.vmem [#allocation7], %s315_s15  ;;  %s319_s7 = sshll.u32 %s531_s12, 7  ;;  %v196_v0 = vld [vmem:[%s171_s22] sm:$0xff]  ;;  %v197_v1 = vld [vmem:[#allocation5] sm:$0xff] }
  0x59   : > { %s215_s6 = sshll.u32 %s195_s21, 4  ;;  %v198_v2 = vadd.f32 %v197_v1, %v196_v0  ;;  %s731_s26 = scalar_lea.hbm %s780_s2, %s319_s7  ;;  %s726_s6 = int_to_ptr.vmem [resolvable:$true] %s215_s6 }
  0x5a   : > { %s201_s17 = scalar_lea.sflag [#allocation4], %s713_s18  ;;  %s453_s28 = scalar_lea.vmem %s726_s6, 128 }
  0x5b   : > { %199 = vst [vmem:[%s195_s21] sm:$0xff] %v198_v2  ;;  %p454_p11 = scmp.ne.s32.totalorder %s726_s6, %s453_s28  ;;  %s543_s12 = smov [#allocation7]  }
  0x5c   : > { %s457_s24 = sshll.u32 %s543_s12, 4  ;;  %s458_s24 = int_to_ptr.vmem [resolvable:$false] %s457_s24 }
  0x5d   : > { %p455_p6 = pnand %p454_p11, %p663_p0  ;;  %s459_s23 = scalar_lea.vmem %s458_s24, 256 }
  0x5e   : > { %p460_p9 = scmp.lt.s32.totalorder %s726_s6, %s458_s24  ;;  %p461_p12 = scmp.lt.s32.totalorder %s459_s23, %s453_s28 }
  0x5f   : > { %p456_p8 = pneg %p455_p6 }
  0x60   : > { %p462_p5 = por %p461_p12, %p460_p9 }
  0x62   : > { %p463_p10 = pnand %p462_p5, %p456_p8 }
  0x64   : > { %466 = shalt.err (!%p463_p10)
}
  0x65   : > { %s467_s30 = scalar_lea.hbm %s731_s26, 128  ;;  %s471_s5 = scalar_lea.hbm %s780_s2, 256 }
  0x66   : > { %p468_p3 = scmp.ne.s32.totalorder %s731_s26, %s467_s30  ;;  %p472_p13 = scmp.lt.u32.totalorder %s731_s26, %s780_s2 }
  0x67   : > { %p473_p7 = scmp.lt.u32.totalorder %s471_s5, %s467_s30  ;;  %p475_p11 = scmp.lt.u32.totalorder %s467_s30, %s731_s26 }
  0x68   : > { %p469_p1 = pnand %p468_p3, %p663_p0 }
  0x69   : > { %p474_p4 = por %p473_p7, %p472_p13 }
  0x6a   : > { %p470_p2 = pneg %p469_p1 }
  0x6b   : > { %p476_p6 = por %p475_p11, %p474_p4 }
  0x6d   : > { %p477_p8 = pnand %p476_p6, %p470_p2 }
  0x6f   : > { %480 = shalt.err (!%p477_p8)
}
  0x70   : > { %328 = dma.vmem_to_hbm [thread:$0]  (%p663_p0), %s726_s6, 128, %s731_s26, %s201_s17  }
  0x71 PF: > { %s227_s16 = sand.u32 1, %s519_s9   ;;  %p799_p9 = scmp.ne.s32.totalorder %s788_s20, 0 }
  0x72   : > { %p800_p12 = scmp.ge.s32.totalorder %s539_s14, 2  ;;  %s228_s22 = scalar_lea.sflag [#allocation4], %s227_s16 }
  0x74   : > { %p339_p5 = pnand %p800_p12, %p799_p9 }
  0x76   : > { %514 = dma.done.wait (!%p339_p5), %s228_s22, 128  }
  0x77   : > { %516 = vsyncadd (!%p339_p5), %s228_s22, 4294967168  ;;  %s19_s14 = sadd.s32 1, %s539_s14   ;;  %s801_s9 = smov %s523_s10 }
  0x78   : > { %p16_p10 = scmp.ge.s32.totalorder %s19_s14, 4   ;;  %s802_s10 = smov %s527_s11 }
  0x79   : > { %s803_s11 = smov %s671_s3  ;;  %s804_s12 = smov %s535_s13 }
  0x7a   : > { %s805_s13 = smov %s807_s25  ;;  %18 = sbr.rel (!%p16_p10) target bundleno = 7 (0x7), region = 78 }
  0x81   :  { %233 = vsyncpa [#allocation3], 1 }
  0x82   :  { %235 = vsyncpa [#allocation3 + $0x1], 1 }
  0x83   :  { %236 = vsyncpa [#allocation6], 1 }
  0x84   :  { %237 = vsyncpa [#allocation4], 1 }
  0x85   :  { %239 = vsyncpa [#allocation4 + $0x1], 1 }

</bundles_post_ra>
